<compile_context>
chip_gen: v5e
topology: v5e:2x2
jax: 0.10.0
libtpu: 0.0.40
codegen_flags: <defaults>
</compile_context>

<pallas_src>
import functools

import jax
import jax.numpy as jnp
import numpy as np
from jax.experimental import pallas as pl
from jax.experimental.pallas import tpu as pltpu

EPS = 1e-5          # PyTorch BatchNorm1d default eps
C_IN = 3            # HistogramNetwork: per-stage channels
EXPANSION = 4       # HistogramNetwork: HSFC expansion
NUM_STAGES = 4      # four chained HSFC stages


# -----------------------------------------------------------------------------
# Pallas kernel: the whole HistogramNetwork forward (4 HSFC stages), fused.
# -----------------------------------------------------------------------------
def _hist_kernel(x_ref, w1_ref, w2_ref, w3_ref, w4_ref,
                 pse_ref, phd_ref, pcp_ref, ppw_ref, o_ref,
                 *, seg_len, num_stages, amt_prev, amt_next):
    nl = x_ref.shape[-1]
    inv_nl = 1.0 / float(nl)                  # hoisted 1/(N*L) for BN stats

    # Boundary masks for the zero-padded k=3 taps, computed ONCE and reused by
    # every grouped conv in every stage (broadcast over sublanes at use site).
    lane = jax.lax.broadcasted_iota(jnp.int32, (1, nl), 1)
    is_first = (lane % seg_len) == 0               # l == 0       -> zero "prev"
    is_last = (lane % seg_len) == (seg_len - 1)    # l == L - 1   -> zero "next"

    def shift_prev(v):
        # out[:, n*L + l] = v[:, n*L + l - 1], zeroed at l == 0 (conv padding).
        return jnp.where(is_first, 0.0, pltpu.roll(v, shift=amt_prev, axis=1))

    def shift_next(v):
        # out[:, n*L + l] = v[:, n*L + l + 1], zeroed at l == L - 1.
        return jnp.where(is_last, 0.0, pltpu.roll(v, shift=amt_next, axis=1))

    def batch_norm(h, gamma, beta):
        # Training-mode BatchNorm1d: per-channel (row) stats over the fused
        # (batch, length) lane axis.  Single sweep (sum & sum-of-squares),
        # then folded into one per-channel affine so the wide tensor only
        # sees a single multiply + add.
        s = jnp.sum(h, axis=1, keepdims=True)
        ss = jnp.sum(h * h, axis=1, keepdims=True)
        mu = s * inv_nl
        var = jnp.maximum(ss * inv_nl - mu * mu, 0.0)
        scale = gamma * jax.lax.rsqrt(var + EPS)        # (rows, 1)
        offset = beta - mu * scale                      # (rows, 1)
        return h * scale + offset

    def conv3(w_ref, s, v):
        # k=3 / pad=1 grouped conv expressed as three block-diagonal MXU matmuls.
        vm = shift_prev(v)
        vp = shift_next(v)
        return (jnp.dot(w_ref[s, 0], vm, preferred_element_type=jnp.float32)
                + jnp.dot(w_ref[s, 1], v, preferred_element_type=jnp.float32)
                + jnp.dot(w_ref[s, 2], vp, preferred_element_type=jnp.float32))

    y = x_ref[...]
    for s in range(num_stages):               # statically unrolled HSFC stages
        # se_conv (grouped, 1->E per group) + BN + ReLU   (conv bias absorbed by BN)
        h = conv3(w1_ref, s, y)
        h = jnp.maximum(batch_norm(h, pse_ref[s, 0], pse_ref[s, 1]), 0.0)
        # hd_conv (grouped, E->E per group) + BN + ReLU
        h = conv3(w2_ref, s, h)
        h = jnp.maximum(batch_norm(h, phd_ref[s, 0], phd_ref[s, 1]), 0.0)
        # cp_conv (grouped 1x1, E->1 per group) + BN (no ReLU)
        h = jnp.dot(w3_ref[s], h, preferred_element_type=jnp.float32)
        h = batch_norm(h, pcp_ref[s, 0], pcp_ref[s, 1])
        # pw_conv (dense 1x1) on the MXU + BN + ReLU
        h = jnp.dot(w4_ref[s], h, preferred_element_type=jnp.float32)
        y = jnp.maximum(batch_norm(h, ppw_ref[s, 0], ppw_ref[s, 1]), 0.0)

    o_ref[...] = y


# -----------------------------------------------------------------------------
# Wrapper
# -----------------------------------------------------------------------------
@functools.partial(jax.jit, static_argnames=("amt_prev", "amt_next"))
def histogram_network_forward(x, packed, *, amt_prev, amt_next):
    """x: (N, C, L) float32.  Returns (N, C*L), like HistogramNetwork.forward."""
    n, c, l = x.shape
    nl = n * l
    num_stages = packed["w1"].shape[0]
    # Lane-dense layout: channels on sublanes, fused (batch, length) on lanes.
    x2d = jnp.transpose(x, (1, 0, 2)).reshape(c, nl)

    kernel = functools.partial(
        _hist_kernel, seg_len=l, num_stages=num_stages,
        amt_prev=amt_prev, amt_next=amt_next)

    vmem = lambda: pl.BlockSpec(memory_space=pltpu.MemorySpace.VMEM)
    args = (x2d, packed["w1"], packed["w2"], packed["w3"], packed["w4"],
            packed["pse"], packed["phd"], packed["pcp"], packed["ppw"])

    y2d = pl.pallas_call(
        kernel,
        out_shape=jax.ShapeDtypeStruct((c, nl), jnp.float32),
        in_specs=[vmem() for _ in args],
        out_specs=vmem(),
        # Entire working set is well under 1 MiB, so a single VMEM-resident
        # grid point is used (fits v5e/v6e/v7x alike).  Scaling to very large
        # N*L would require a tiled two-pass BatchNorm (sum/sumsq accumulation
        # over an 'arbitrary' grid axis, then a normalize pass).
        compiler_params=pltpu.CompilerParams(vmem_limit_bytes=32 * 1024 * 1024),
    )(*args)

    # (C, N*L) -> (N, C, L) -> flatten(1), matching the PyTorch module.
    return y2d.reshape(c, n, l).transpose(1, 0, 2).reshape(n, c * l)


def _roll_shift_amounts(n):
    """Probe pltpu.roll's rotate convention once (tiny pallas_call) so the
    zero-padded k=3 shifts are exact under either convention.

    Returns (amt_prev, amt_next) with
      pltpu.roll(v, amt_prev, axis=1)[:, p] == v[:, p - 1]  (mod n)
      pltpu.roll(v, amt_next, axis=1)[:, p] == v[:, p + 1]  (mod n)
    """
    def probe(x_ref, o_ref):
        o_ref[...] = pltpu.roll(x_ref[...], shift=1, axis=1)

    ramp = jnp.tile(jnp.arange(128, dtype=jnp.float32)[None, :], (8, 1))
    rolled = pl.pallas_call(
        probe, out_shape=jax.ShapeDtypeStruct((8, 128), jnp.float32))(ramp)
    if float(rolled[0, 1]) == 0.0:      # numpy-style roll: out[p] = in[p-1]
        return 1, n - 1
    return n - 1, 1                     # rotate-left convention: out[p] = in[p+1]


# -----------------------------------------------------------------------------
# Parameters (PyTorch shapes) + packing into kernel-ready block matrices
# -----------------------------------------------------------------------------
def init_stage_params(key, c, e):
    """Deterministic PyTorch-shaped parameters for one HSFC(c, e) block."""
    ce = c * e
    ks = jax.random.split(key, 16)
    rnd = lambda k, shape, s: s * jax.random.normal(k, shape, jnp.float32)
    return dict(
        w_se=rnd(ks[0], (ce, 1, 3), 0.5),  b_se=rnd(ks[1], (ce,), 0.1),
        g_se=1.0 + rnd(ks[2], (ce,), 0.1), be_se=rnd(ks[3], (ce,), 0.1),
        w_hd=rnd(ks[4], (ce, e, 3), 0.3),  b_hd=rnd(ks[5], (ce,), 0.1),
        g_hd=1.0 + rnd(ks[6], (ce,), 0.1), be_hd=rnd(ks[7], (ce,), 0.1),
        w_cp=rnd(ks[8], (c, e, 1), 0.4),   b_cp=rnd(ks[9], (c,), 0.1),
        g_cp=1.0 + rnd(ks[10], (c,), 0.1), be_cp=rnd(ks[11], (c,), 0.1),
        w_pw=rnd(ks[12], (c, c, 1), 0.5),  b_pw=rnd(ks[13], (c,), 0.1),
        g_pw=1.0 + rnd(ks[14], (c,), 0.1), be_pw=rnd(ks[15], (c,), 0.1),
    )


def pack_params(stage_params, c, e):
    """Pack per-stage PyTorch-shaped params into stacked, kernel-ready arrays.

    Grouped convolutions become block-diagonal dense matrices (one per tap) so
    the kernel can run them as plain MXU matmuls in the (channels, N*L)
    layout.  Conv biases are NOT packed: each conv is immediately followed by
    a training-mode BatchNorm whose per-channel batch-mean subtraction exactly
    cancels any per-channel additive constant, so the biases have no effect on
    the forward output (the float64 reference below adds them and agrees).
    """
    s_n = len(stage_params)
    ce = c * e
    w1 = np.zeros((s_n, 3, ce, c), np.float32)     # se_conv taps
    w2 = np.zeros((s_n, 3, ce, ce), np.float32)    # hd_conv taps
    w3 = np.zeros((s_n, c, ce), np.float32)        # cp_conv (grouped 1x1)
    w4 = np.zeros((s_n, c, c), np.float32)         # pw_conv (dense 1x1)
    pse = np.zeros((s_n, 2, ce, 1), np.float32)    # [bn gamma, bn beta]
    phd = np.zeros((s_n, 2, ce, 1), np.float32)
    pcp = np.zeros((s_n, 2, c, 1), np.float32)
    ppw = np.zeros((s_n, 2, c, 1), np.float32)
    for si, p in enumerate(stage_params):
        pn = {k: np.asarray(v, np.float32) for k, v in p.items()}
        for o in range(ce):
            g = o // e                              # PyTorch group of out chan o
            w1[si, :, o, g] = pn["w_se"][o, 0, :]
            w2[si, :, o, g * e:(g + 1) * e] = pn["w_hd"][o].T
        for ci in range(c):
            w3[si, ci, ci * e:(ci + 1) * e] = pn["w_cp"][ci, :, 0]
        w4[si] = pn["w_pw"][:, :, 0]
        pse[si] = np.stack([pn["g_se"], pn["be_se"]])[:, :, None]
        phd[si] = np.stack([pn["g_hd"], pn["be_hd"]])[:, :, None]
        pcp[si] = np.stack([pn["g_cp"], pn["be_cp"]])[:, :, None]
        ppw[si] = np.stack([pn["g_pw"], pn["be_pw"]])[:, :, None]
    packed = dict(w1=w1, w2=w2, w3=w3, w4=w4, pse=pse, phd=phd, pcp=pcp, ppw=ppw)
    return {k: jnp.asarray(v) for k, v in packed.items()}


# -----------------------------------------------------------------------------
# Pure NumPy (float64) reference of the PyTorch forward, for validation.
# (Includes the conv biases, unlike the kernel — validating the BN-absorption.)
# -----------------------------------------------------------------------------
def _ref_grouped_conv(x, w, b, groups):
    n, _, l = x.shape
    o_ch, in_per_g, k = w.shape
    out_per_g = o_ch // groups
    pad = (k - 1) // 2
    xp = np.pad(x, ((0, 0), (0, 0), (pad, pad)))
    out = np.zeros((n, o_ch, l), np.float64)
    for o in range(o_ch):
        g = o // out_per_g
        for i in range(in_per_g):
            ci = g * in_per_g + i
            for kk in range(k):
                out[:, o, :] += w[o, i, kk] * xp[:, ci, kk:kk + l]
    return out + b[None, :, None]


def _ref_bn(x, gamma, beta, relu):
    mu = x.mean(axis=(0, 2), keepdims=True)
    var = ((x - mu) ** 2).mean(axis=(0, 2), keepdims=True)
    y = (x - mu) / np.sqrt(var + EPS) * gamma[None, :, None] + beta[None, :, None]
    return np.maximum(y, 0.0) if relu else y


def _ref_hsfc(x, p, groups):
    h = _ref_grouped_conv(x, p["w_se"], p["b_se"], groups)
    h = _ref_bn(h, p["g_se"], p["be_se"], relu=True)
    h = _ref_grouped_conv(h, p["w_hd"], p["b_hd"], groups)
    h = _ref_bn(h, p["g_hd"], p["be_hd"], relu=True)
    h = _ref_grouped_conv(h, p["w_cp"], p["b_cp"], groups)
    h = _ref_bn(h, p["g_cp"], p["be_cp"], relu=False)
    h = _ref_grouped_conv(h, p["w_pw"], p["b_pw"], groups=1)
    h = _ref_bn(h, p["g_pw"], p["be_pw"], relu=True)
    return h


def _ref_histogram_network(x, stage_params):
    h = np.asarray(x, np.float64)
    for p in stage_params:
        p64 = {k: np.asarray(v, np.float64) for k, v in p.items()}
        h = _ref_hsfc(h, p64, groups=h.shape[1])
    return h.reshape(h.shape[0], -1)


# -----------------------------------------------------------------------------
if __name__ == "__main__":
    batch, length = 2, 256                 # 256-bin histograms, 3 channels
    c, e = C_IN, EXPANSION

    root = jax.random.PRNGKey(0)
    k_x, k_p = jax.random.split(root)
    x = jax.random.normal(k_x, (batch, c, length), jnp.float32)
    stage_params = [init_stage_params(k, c, e)
                    for k in jax.random.split(k_p, NUM_STAGES)]
    packed = pack_params(stage_params, c, e)

    amt_prev, amt_next = _roll_shift_amounts(batch * length)

    out = histogram_network_forward(x, packed,
                                    amt_prev=amt_prev, amt_next=amt_next)
    out = jax.block_until_ready(out)

    assert out.shape == (batch, c * length) and out.dtype == jnp.float32
    assert bool(jnp.all(jnp.isfinite(out)))
    assert bool(jnp.all(out >= 0.0))       # final op is a ReLU

    # Validate against a float64 NumPy reference of the PyTorch forward
    # (tolerance is loose to absorb MXU f32 matmul + fused BN-stat rounding).
    ref = _ref_histogram_network(np.asarray(x), stage_params)
    np.testing.assert_allclose(np.asarray(out, np.float64), ref,
                               rtol=5e-2, atol=5e-2)

    print("KERNEL_OK")
</pallas_src>

<mosaic_0001>
module attributes {stable_mosaic.version = 11 : i64} {
  func.func @probe(%arg0: memref<8x128xf32, #tpu.memory_space<vmem>>, %arg1: memref<8x128xf32, #tpu.memory_space<vmem>>) attributes {dimension_semantics = [], scalar_prefetch = 0 : i64, scratch_operands = 0 : i64, tpu.core_type = #tpu.core_type<tc>} {
    %c0 = arith.constant 0 : index
    %c0_0 = arith.constant 0 : index
    %0 = vector.load %arg0[%c0, %c0_0] : memref<8x128xf32, #tpu.memory_space<vmem>>, vector<8x128xf32>
    %c1_i32 = arith.constant 1 : i32
    %1 = tpu.dynamic_rotate %0 by %c1_i32 dim 1 : vector<8x128xf32>, i32 -> vector<8x128xf32>
    %c0_1 = arith.constant 0 : index
    %c0_2 = arith.constant 0 : index
    %2 = vector.load %arg1[%c0_1, %c0_2] : memref<8x128xf32, #tpu.memory_space<vmem>>, vector<8x128xf32>
    tpu.vector_store %arg1[%c0_1, %c0_2], %1 {strides = array<i32>} : memref<8x128xf32, #tpu.memory_space<vmem>>, vector<8x128xf32>,
    return
  }
}

</mosaic_0001>

<bundles_post_ra>
// kernel: tpu_custom_call.1
= control target key start
LH: loop header
LB: loop body
LE: loop exit
PB: predicated region body
PF: predicated region fallthrough
CT: control target
= control target key end

     0   :  { %6 = vsyncpa [#allocation3], 0  ;;  %s118_s0 = inlined_call_operand.hbm [shape: f32[8,128], index: 0, kind: input, shape index: {}]   ;;  %s119_s1 = inlined_call_operand.hbm [shape: f32[8,128], index: 1, kind: output, shape index: {}]  }
   0x1   :  { %7 = vsyncpa [#allocation4], 0  ;;  %s13_s8 = sshll.u32 %s118_s0, 4  ;;  %s99_s9 = smov [#allocation2]   ;;  %s14_s8 = int_to_ptr.hbm [resolvable:$true] %s13_s8 }
   0x2   :  { %s15_s10 = sshll.u32 %s99_s9, 4  ;;  %s16_s10 = int_to_ptr.vmem [resolvable:$true] %s15_s10 }
   0x3   :  { %18 = dma.hbm_to_vmem [thread:$0]  %s14_s8, 128, %s16_s10, [#allocation3]  }
   0x4   :  { %95 = dma.done.wait [#allocation3], 128  }
   0x5   :  { %96 = vsyncadd [#allocation3], 4294967168  ;;  %v23_v0 = vld [vmem:[#allocation2] sm:$0xff]  ;;  %s100_s11 = smov 1   ;;  %s101_s12 = smov [#allocation5]  }
   0x6   :  { %24 = vrot.lane.b32.xlu0 %v23_v0, %s100_s11  ;;  %s32_s13 = sshll.u32 %s101_s12, 4  ;;  %s34_s16 = sshll.u32 %s119_s1, 4  ;;  %s33_s13 = int_to_ptr.vmem [resolvable:$true] %s32_s13  ;;  %s35_s16 = int_to_ptr.hbm [resolvable:$true] %s34_s16 }
  0x78   :  { %v25_v1 = vpop.permute.xlu0 %24 }
  0x79   :  { %26 = vst [vmem:[#allocation5] sm:$0xff] %v25_v1 }
  0x7a   :  { %37 = dma.vmem_to_hbm [thread:$0]  %s33_s13, 128, %s35_s16, [#allocation4]  }
  0x7b   :  { %97 = dma.done.wait [#allocation4], 128  }
  0x7c   :  { %98 = vsyncadd [#allocation4], 4294967168 }
  0x7d   :  { %42 = vsyncpa [#allocation3], 1 }
  0x7e   :  { %43 = vsyncpa [#allocation4], 1 }

</bundles_post_ra>
